<compile_context>
chip_gen: v5e
topology: v5e:2x2
jax: 0.10.0
libtpu: 0.0.40
codegen_flags: <defaults>
</compile_context>

<pallas_src>
import functools

import numpy as np
import jax
import jax.numpy as jnp
from jax import lax
from jax.experimental import pallas as pl
from jax.experimental.pallas import tpu as pltpu


# -----------------------------------------------------------------------------
# Pallas kernel (one (TM, TN) tile of the padded 2B x 2B kernel space)
# -----------------------------------------------------------------------------
def _int_power(x, p):
    """x**p for a small static integer p >= 1 via repeated multiplies (VALU)."""
    out = x
    for _ in range(p - 1):
        out = out * x
    return out


def lmmd_tile_kernel(scal_ref, zr_ref, zc_ref, sqr_ref, sqc_ref, rw_ref, cw_ref,
                     out_ref, acc_ref, *, kernel_mul, kernel_num):
    j = pl.program_id(1)
    n_j = pl.num_programs(1)

    @pl.when(j == 0)
    def _():
        acc_ref[...] = jnp.zeros_like(acc_ref)

    neg_inv_bw = scal_ref[0]               # -1 / (widest bandwidth), f32 scalar

    # zr is pre-scaled by -2 in the wrapper, so this MXU dot is -2*<z_i, z_j>.
    dn = (((1,), (1,)), ((), ()))          # contract the feature dim
    p2 = lax.dot_general(zr_ref[...], zc_ref[...], dn,
                         preferred_element_type=jnp.float32)        # (TM, TN)

    # ||z_i - z_j||^2; clamp: a^2 + b^2 - 2ab can go slightly negative (fp).
    l2 = jnp.maximum(sqr_ref[...] + sqc_ref[...] + p2, 0.0)

    # Multi-bandwidth RBF sum.  Widest bandwidth -> one exp; narrower ones by
    # repeated integer powers: exp(-l2/bw_i) = exp(-l2/bw_{i+1}) ** mul.
    int_mul = int(round(kernel_mul))
    if abs(kernel_mul - int_mul) < 1e-12 and int_mul >= 2:
        e = jnp.exp(l2 * neg_inv_bw)
        ktot = e
        for _ in range(kernel_num - 1):
            e = _int_power(e, int_mul)
            ktot = ktot + e
    else:
        ktot = jnp.zeros_like(l2)
        for i in range(kernel_num):
            scale = float(kernel_mul ** (kernel_num - 1 - i))
            ktot = ktot + jnp.exp(l2 * (neg_inv_bw * scale))

    # Fold the class weights onto the MXU: acc += K_tile @ Cw_tile  -> (TM, Cp)
    kc = lax.dot_general(ktot, cw_ref[...], (((1,), (0,)), ((), ())),
                         preferred_element_type=jnp.float32)
    acc_ref[...] += kc

    @pl.when(j == n_j - 1)
    def _():
        # per-row-tile partial of  sum( R ⊙ (K @ Cw) ); broadcast into the
        # (8,128) out block (wrapper reads element [0, 0] of each block).
        partial = jnp.sum(rw_ref[...] * acc_ref[...])
        out_ref[...] = jnp.zeros_like(out_ref) + partial


# -----------------------------------------------------------------------------
# Module wrapper (parameters / state mirror the PyTorch module's __init__)
# -----------------------------------------------------------------------------
def _round_up(x, m):
    return ((x + m - 1) // m) * m


class LMMDLossPallas:
    def __init__(self, num_classes, kernel_type="rbf", kernel_mul=2.0,
                 kernel_num=5, fix_sigma=None, gamma=1.0, max_iter=1000,
                 tile=512):
        assert kernel_type == "rbf"
        self.num_classes = num_classes
        self.kernel_mul = float(kernel_mul)
        self.kernel_num = int(kernel_num)
        self.fix_sigma = None            # torch module forces this to None
        self.gamma = float(gamma)
        self.max_iter = int(max_iter)
        self.curr_iter = 0
        # Tile of the (2B x 2B) kernel space (multiple of 128).  512 keeps the
        # live set well inside v7x's 64 MiB VMEM; v5e/v6e (128 MiB) can use 1024.
        self.tile = int(tile)

    def lamb(self):
        p = self.curr_iter / self.max_iter
        return 2.0 / (1.0 + np.exp(-self.gamma * p)) - 1.0

    def step(self):
        self.curr_iter = min(self.curr_iter + 1, self.max_iter)

    def forward(self, source, target, source_label, target_logits):
        source = jnp.asarray(source)     # keep native dtype (f32 or bf16)
        target = jnp.asarray(target)
        feat_dtype = source.dtype
        B, D = source.shape
        C = self.num_classes
        N = 2 * B

        # ---- cal_weight glue (exact port of the numpy code, in JAX) --------
        onehot = jax.nn.one_hot(source_label, C, dtype=jnp.float32)    # (B, C)
        s_sum = jnp.sum(onehot, axis=0, keepdims=True)
        s_sum = jnp.where(s_sum == 0, jnp.float32(100.0), s_sum)
        s_norm = onehot / s_sum

        t_logits = jnp.asarray(target_logits, dtype=jnp.float32)
        t_sum = jnp.sum(t_logits, axis=0, keepdims=True)
        t_sum = jnp.where(t_sum == 0, jnp.float32(100.0), t_sum)
        t_norm = t_logits / t_sum

        t_label = jnp.argmax(t_logits, axis=1)
        present_s = jnp.any(onehot > 0, axis=0)
        present_t = jnp.any(jax.nn.one_hot(t_label, C, dtype=jnp.float32) > 0,
                            axis=0)
        mask = (present_s & present_t).astype(jnp.float32)              # (C,)
        count = jnp.sum(mask)
        inv_count = jnp.where(count > 0, 1.0 / count, 0.0).astype(jnp.float32)

        # Signed row/col class weights.  The full 2Bx2B weight matrix is
        #   W[i,j] = sign(i)*sign(j) * <row_w[i], col_w[j]>   (+1 src, -1 tgt),
        # hence sum_ij W*K = sum( R ⊙ (K @ Cw) ), R=[s_m;-t_m], Cw=[s_w;-t_w].
        s_m = s_norm * mask[None, :]
        t_m = t_norm * mask[None, :]
        rw = jnp.concatenate([s_m, -t_m], axis=0)                       # (N, C)
        cw = jnp.concatenate([s_norm, -t_norm], axis=0)                 # (N, C)

        # ---- features: concat, mean-center (distance-invariant), norms -----
        z = jnp.concatenate([source, target], axis=0).astype(jnp.float32)
        z = z - jnp.mean(z, axis=0, keepdims=True)   # robust a^2+b^2-2ab
        sq = jnp.sum(z * z, axis=-1)                                    # (N,)

        # Closed-form bandwidth (no NxN reduction):
        #   sum_ij ||z_i - z_j||^2 = 2N*sum_i ||z_i||^2 - 2*||sum_i z_i||^2
        colsum = jnp.sum(z, axis=0)
        sum_l2 = 2.0 * N * jnp.sum(sq) - 2.0 * jnp.sum(colsum * colsum)
        bandwidth = sum_l2 / float(N * N - N)
        bandwidth = bandwidth / float(self.kernel_mul ** (self.kernel_num // 2))
        # widest bandwidth; bandwidth==0 -> -inf -> NaN kernels -> loss 0 (torch).
        neg_inv_bw = -1.0 / (bandwidth *
                             float(self.kernel_mul ** (self.kernel_num - 1)))
        scalars = jnp.asarray(neg_inv_bw, jnp.float32).reshape(1)

        # ---- pad to the tile grid -------------------------------------------
        tile_cap = max(128, (self.tile // 128) * 128)
        tile = min(tile_cap, _round_up(N, 128))
        n_pad = _round_up(N, tile)
        n_t = n_pad // tile
        Cp = _round_up(C, 128)          # lane-dense class dim for the MXU

        def pad2(a, rows, cols):
            return jnp.pad(a, ((0, rows - a.shape[0]), (0, cols - a.shape[1])))

        z_cols = pad2(z, n_pad, D).astype(feat_dtype)
        z_rows = z_cols * jnp.asarray(-2.0, feat_dtype)   # fold the -2 (exact)
        sq_pad = jnp.pad(sq, (0, n_pad - N)).astype(jnp.float32)
        sq_row = sq_pad.reshape(n_pad, 1)
        sq_col = sq_pad.reshape(1, n_pad)
        rw_pad = pad2(rw, n_pad, Cp)
        cw_pad = pad2(cw, n_pad, Cp)

        # ---- generation-aware VMEM budget ------------------------------------
        feat_bytes = jnp.dtype(feat_dtype).itemsize
        try:
            vmem_cap = int(getattr(pltpu.get_tpu_info(), "vmem_capacity_bytes",
                                   64 << 20))
        except Exception:
            vmem_cap = 64 << 20
        est = (2 * 2 * tile * D * feat_bytes   # z row/col tiles, double-buffered
               + 2 * 2 * tile * Cp * 4         # rw/cw tiles, double-buffered
               + 2 * 2 * tile * 128 * 4        # row/col norms (lane-padded)
               + 6 * tile * tile * 4           # p2 / l2 / e / ktot live temps
               + tile * Cp * 4 + 8 * 128 * 4   # accumulator scratch + out block
               + (4 << 20))                    # headroom
        vmem_limit = int(min(max(est, 16 << 20), int(0.85 * vmem_cap)))

        kernel = functools.partial(lmmd_tile_kernel,
                                   kernel_mul=self.kernel_mul,
                                   kernel_num=self.kernel_num)

        out = pl.pallas_call(
            kernel,
            out_shape=jax.ShapeDtypeStruct((n_t * 8, 128), jnp.float32),
            grid=(n_t, n_t),
            in_specs=[
                pl.BlockSpec(memory_space=pltpu.MemorySpace.SMEM),      # scalar
                pl.BlockSpec((tile, D), lambda i, j: (i, 0)),           # -2*z rows
                pl.BlockSpec((tile, D), lambda i, j: (j, 0)),           # z cols
                pl.BlockSpec((tile, 1), lambda i, j: (i, 0)),           # ||z||^2 rows
                pl.BlockSpec((1, tile), lambda i, j: (0, j)),           # ||z||^2 cols
                pl.BlockSpec((tile, Cp), lambda i, j: (i, 0)),          # R rows
                pl.BlockSpec((tile, Cp), lambda i, j: (j, 0)),          # Cw cols
            ],
            out_specs=pl.BlockSpec((8, 128), lambda i, j: (i, 0)),
            scratch_shapes=[pltpu.VMEM((tile, Cp), jnp.float32)],
            compiler_params=pltpu.CompilerParams(
                dimension_semantics=("parallel", "arbitrary"),
                vmem_limit_bytes=vmem_limit),
        )(scalars, z_rows, z_cols, sq_row, sq_col, rw_pad, cw_pad)

        per_tile = out[::8, 0]                      # one partial per row tile
        loss_raw = jnp.sum(per_tile) * inv_count
        # torch returns 0 when the summed kernels contain NaN; NaN propagates
        # through the MXU accumulate and the weighted reduce (0 * NaN = NaN),
        # so a single scalar check on loss_raw is equivalent.
        # TODO(synk): torch also skips the lambda-scheduler step on NaN; here
        # curr_iter (host-side Python state) advances unconditionally.
        loss = jnp.where(jnp.isnan(loss_raw), jnp.float32(0.0),
                         loss_raw * jnp.float32(self.lamb()))
        self.step()
        return loss.reshape(1)  # torch returns a shape-(1,) tensor


# -----------------------------------------------------------------------------
# Pure-JAX reference (literal port of the torch/numpy math) for a sanity check
# -----------------------------------------------------------------------------
def lmmd_reference(source, target, source_label, target_logits,
                   num_classes, kernel_mul, kernel_num, lamb):
    B = source.shape[0]
    total = jnp.concatenate([source, target], axis=0).astype(jnp.float32)
    diff = total[None, :, :] - total[:, None, :]
    L2 = jnp.sum(diff * diff, axis=2)
    n = 2 * B
    bandwidth = jnp.sum(L2) / (n * n - n)
    bandwidth = bandwidth / (kernel_mul ** (kernel_num // 2))
    kernels = sum(jnp.exp(-L2 / (bandwidth * kernel_mul ** i))
                  for i in range(kernel_num))

    onehot = jax.nn.one_hot(source_label, num_classes, dtype=jnp.float32)
    s_sum = jnp.sum(onehot, axis=0, keepdims=True)
    s_sum = jnp.where(s_sum == 0, 100.0, s_sum)
    s_norm = onehot / s_sum
    t_logits = target_logits.astype(jnp.float32)
    t_sum = jnp.sum(t_logits, axis=0, keepdims=True)
    t_sum = jnp.where(t_sum == 0, 100.0, t_sum)
    t_norm = t_logits / t_sum
    t_label = jnp.argmax(t_logits, axis=1)
    present_s = jnp.any(onehot > 0, axis=0)
    present_t = jnp.any(jax.nn.one_hot(t_label, num_classes) > 0, axis=0)
    mask = (present_s & present_t).astype(jnp.float32)
    count = jnp.sum(mask)
    inv_count = jnp.where(count > 0, 1.0 / count, 0.0)
    s_m = s_norm * mask[None, :]
    t_m = t_norm * mask[None, :]
    w_ss = s_m @ s_norm.T * inv_count
    w_tt = t_m @ t_norm.T * inv_count
    w_st = s_m @ t_norm.T * inv_count

    SS = kernels[:B, :B]
    TT = kernels[B:, B:]
    ST = kernels[:B, B:]
    loss = jnp.sum(w_ss * SS + w_tt * TT - 2.0 * w_st * ST)
    return jnp.where(jnp.any(jnp.isnan(kernels)), 0.0, loss * lamb)


if __name__ == "__main__":
    key = jax.random.PRNGKey(0)
    k1, k2, k3, k4, k5, k6, k7, k8 = jax.random.split(key, 8)

    # ---- test 1: small shapes, single-tile grid -----------------------------
    B, D, C = 8, 32, 4
    source = jax.random.normal(k1, (B, D), dtype=jnp.float32)
    target = jax.random.normal(k2, (B, D), dtype=jnp.float32)
    source_label = jax.random.randint(k3, (B,), 0, C, dtype=jnp.int32)
    target_logits = jax.nn.softmax(
        jax.random.normal(k4, (B, C), dtype=jnp.float32), axis=-1)

    mod = LMMDLossPallas(num_classes=C, kernel_type="rbf", kernel_mul=2.0,
                         kernel_num=5, gamma=1.0, max_iter=1000)

    out0 = jax.block_until_ready(
        mod.forward(source, target, source_label, target_logits))  # lamb = 0
    lamb1 = mod.lamb()
    out1 = jax.block_until_ready(
        mod.forward(source, target, source_label, target_logits))
    ref1 = jax.block_until_ready(
        lmmd_reference(source, target, source_label, target_logits,
                       C, 2.0, 5, lamb1))
    assert np.isfinite(np.asarray(out0)).all()
    assert np.isfinite(np.asarray(out1)).all()
    np.testing.assert_allclose(np.asarray(out1)[0], np.asarray(ref1),
                               rtol=5e-2, atol=5e-5)

    # ---- test 2: multi-tile (2x2) grid with row padding ----------------------
    B2, D2, C2 = 72, 64, 6
    src2 = jax.random.normal(k5, (B2, D2), dtype=jnp.float32)
    tgt2 = jax.random.normal(k6, (B2, D2), dtype=jnp.float32)
    lbl2 = jax.random.randint(k7, (B2,), 0, C2, dtype=jnp.int32)
    lgt2 = jax.nn.softmax(
        jax.random.normal(k8, (B2, C2), dtype=jnp.float32), axis=-1)

    mod2 = LMMDLossPallas(num_classes=C2, kernel_type="rbf", kernel_mul=2.0,
                          kernel_num=5, gamma=1.0, max_iter=1000, tile=128)
    mod2.curr_iter = 100
    lamb2 = mod2.lamb()
    out2 = jax.block_until_ready(mod2.forward(src2, tgt2, lbl2, lgt2))
    ref2 = jax.block_until_ready(
        lmmd_reference(src2, tgt2, lbl2, lgt2, C2, 2.0, 5, lamb2))
    assert np.isfinite(np.asarray(out2)).all()
    np.testing.assert_allclose(np.asarray(out2)[0], np.asarray(ref2),
                               rtol=5e-2, atol=5e-5)

    print("KERNEL_OK")
</pallas_src>

<mosaic_0001>
module attributes {stable_mosaic.version = 11 : i64} {
  func.func @lmmd_tile_kernel(%arg0: i32, %arg1: i32, %arg2: memref<1xf32, #tpu.memory_space<smem>>, %arg3: memref<128x32xf32, #tpu.memory_space<vmem>>, %arg4: memref<128x32xf32, #tpu.memory_space<vmem>>, %arg5: memref<128x1xf32, #tpu.memory_space<vmem>>, %arg6: memref<1x128xf32, #tpu.memory_space<vmem>>, %arg7: memref<128x128xf32, #tpu.memory_space<vmem>>, %arg8: memref<128x128xf32, #tpu.memory_space<vmem>>, %arg9: memref<8x128xf32, #tpu.memory_space<vmem>>, %arg10: memref<128x128xf32, #tpu.memory_space<vmem>>) attributes {dimension_semantics = [#tpu.dimension_semantics<parallel>, #tpu.dimension_semantics<arbitrary>], iteration_bounds = array<i64: 1, 1>, scalar_prefetch = 0 : i64, scratch_operands = 1 : i64, tpu.core_type = #tpu.core_type<tc>, window_params = [{transform_indices = @transform_0, window_bounds = array<i64: 1>}, {transform_indices = @transform_1, window_bounds = array<i64: 128, 32>}, {transform_indices = @transform_2, window_bounds = array<i64: 128, 32>}, {transform_indices = @transform_3, window_bounds = array<i64: 128, 1>}, {transform_indices = @transform_4, window_bounds = array<i64: 1, 128>}, {transform_indices = @transform_5, window_bounds = array<i64: 128, 128>}, {transform_indices = @transform_6, window_bounds = array<i64: 128, 128>}, {transform_indices = @transform_7, window_bounds = array<i64: 8, 128>}]} {
    %c0_i32 = arith.constant 0 : i32
    %0 = arith.cmpi eq, %arg1, %c0_i32 : i32
    %1 = arith.extui %0 : i1 to i32
    %c0_i32_0 = arith.constant 0 : i32
    %2 = arith.cmpi ne, %1, %c0_i32_0 : i32
    scf.if %2 {
      %cst_19 = arith.constant 0.000000e+00 : f32
      %34 = vector.broadcast %cst_19 : f32 to vector<128x128xf32>
      %c0_20 = arith.constant 0 : index
      %c0_21 = arith.constant 0 : index
      %35 = vector.load %arg10[%c0_20, %c0_21] : memref<128x128xf32, #tpu.memory_space<vmem>>, vector<128x128xf32>
      tpu.vector_store %arg10[%c0_20, %c0_21], %34 {strides = array<i32>} : memref<128x128xf32, #tpu.memory_space<vmem>>, vector<128x128xf32>,
    } else {
    }
    %c0 = arith.constant 0 : index
    %3 = memref.load %arg2[%c0] : memref<1xf32, #tpu.memory_space<smem>>
    %c0_1 = arith.constant 0 : index
    %c0_2 = arith.constant 0 : index
    %4 = vector.load %arg3[%c0_1, %c0_2] : memref<128x32xf32, #tpu.memory_space<vmem>>, vector<128x32xf32>
    %c0_3 = arith.constant 0 : index
    %c0_4 = arith.constant 0 : index
    %5 = vector.load %arg4[%c0_3, %c0_4] : memref<128x32xf32, #tpu.memory_space<vmem>>, vector<128x32xf32>
    %cst = arith.constant dense<0.000000e+00> : vector<128x128xf32>
    %6 = tpu.matmul %4, %5, %cst {dimension_numbers = #tpu.dot_dimension_numbers<[1], [1], [0], [0], [0, 0, 1, 0], [], []>} : vector<128x32xf32>, vector<128x32xf32>, vector<128x128xf32> -> vector<128x128xf32>
    %c0_5 = arith.constant 0 : index
    %c0_6 = arith.constant 0 : index
    %7 = vector.load %arg5[%c0_5, %c0_6] : memref<128x1xf32, #tpu.memory_space<vmem>>, vector<128x1xf32>
    %c0_7 = arith.constant 0 : index
    %c0_8 = arith.constant 0 : index
    %8 = vector.load %arg6[%c0_7, %c0_8] : memref<1x128xf32, #tpu.memory_space<vmem>>, vector<1x128xf32>
    %9 = vector.broadcast %7 : vector<128x1xf32> to vector<128x128xf32>
    %10 = vector.broadcast %8 : vector<1x128xf32> to vector<128x128xf32>
    %11 = arith.addf %9, %10 : vector<128x128xf32>
    %12 = arith.addf %11, %6 : vector<128x128xf32>
    %cst_9 = arith.constant 0.000000e+00 : f32
    %13 = vector.broadcast %cst_9 : f32 to vector<128x128xf32>
    %14 = arith.maximumf %12, %13 : vector<128x128xf32>
    %15 = vector.broadcast %3 : f32 to vector<128x128xf32>
    %16 = arith.mulf %14, %15 : vector<128x128xf32>
    %17 = math.exp %16 : vector<128x128xf32>
    %18 = arith.mulf %17, %17 : vector<128x128xf32>
    %19 = arith.addf %17, %18 : vector<128x128xf32>
    %20 = arith.mulf %18, %18 : vector<128x128xf32>
    %21 = arith.addf %19, %20 : vector<128x128xf32>
    %22 = arith.mulf %20, %20 : vector<128x128xf32>
    %23 = arith.addf %21, %22 : vector<128x128xf32>
    %24 = arith.mulf %22, %22 : vector<128x128xf32>
    %25 = arith.addf %23, %24 : vector<128x128xf32>
    %c0_10 = arith.constant 0 : index
    %c0_11 = arith.constant 0 : index
    %26 = vector.load %arg8[%c0_10, %c0_11] : memref<128x128xf32, #tpu.memory_space<vmem>>, vector<128x128xf32>
    %cst_12 = arith.constant dense<0.000000e+00> : vector<128x128xf32>
    %27 = tpu.matmul %25, %26, %cst_12 {dimension_numbers = #tpu.dot_dimension_numbers<[1], [0], [0], [1], [0, 0, 1, 1], [], []>} : vector<128x128xf32>, vector<128x128xf32>, vector<128x128xf32> -> vector<128x128xf32>
    %c0_13 = arith.constant 0 : index
    %c0_14 = arith.constant 0 : index
    %28 = vector.load %arg10[%c0_13, %c0_14] : memref<128x128xf32, #tpu.memory_space<vmem>>, vector<128x128xf32>
    %29 = arith.addf %28, %27 : vector<128x128xf32>
    %c0_15 = arith.constant 0 : index
    %c0_16 = arith.constant 0 : index
    %30 = vector.load %arg10[%c0_15, %c0_16] : memref<128x128xf32, #tpu.memory_space<vmem>>, vector<128x128xf32>
    tpu.vector_store %arg10[%c0_15, %c0_16], %29 {strides = array<i32>} : memref<128x128xf32, #tpu.memory_space<vmem>>, vector<128x128xf32>,
    %c0_i32_17 = arith.constant 0 : i32
    %31 = arith.cmpi eq, %arg1, %c0_i32_17 : i32
    %32 = arith.extui %31 : i1 to i32
    %c0_i32_18 = arith.constant 0 : i32
    %33 = arith.cmpi ne, %32, %c0_i32_18 : i32
    scf.if %33 {
      %c0_19 = arith.constant 0 : index
      %c0_20 = arith.constant 0 : index
      %34 = vector.load %arg7[%c0_19, %c0_20] : memref<128x128xf32, #tpu.memory_space<vmem>>, vector<128x128xf32>
      %c0_21 = arith.constant 0 : index
      %c0_22 = arith.constant 0 : index
      %35 = vector.load %arg10[%c0_21, %c0_22] : memref<128x128xf32, #tpu.memory_space<vmem>>, vector<128x128xf32>
      %36 = arith.mulf %34, %35 : vector<128x128xf32>
      %37 = vector.shape_cast %36 : vector<128x128xf32> to vector<1x128x128xf32>
      %cst_23 = arith.constant dense<0.000000e+00> : vector<1xf32>
      %38 = vector.multi_reduction <add>, %37, %cst_23 [1, 2] : vector<1x128x128xf32> to vector<1xf32>
      %39 = vector.shape_cast %38 : vector<1xf32> to vector<1x1x1xf32>
      %40 = vector.extract %39[0, 0, 0] : f32 from vector<1x1x1xf32>
      %cst_24 = arith.constant 0.000000e+00 : f32
      %41 = vector.broadcast %cst_24 : f32 to vector<8x128xf32>
      %42 = vector.broadcast %40 : f32 to vector<8x128xf32>
      %43 = arith.addf %41, %42 : vector<8x128xf32>
      %c0_25 = arith.constant 0 : index
      %c0_26 = arith.constant 0 : index
      %44 = vector.load %arg9[%c0_25, %c0_26] : memref<8x128xf32, #tpu.memory_space<vmem>>, vector<8x128xf32>
      tpu.vector_store %arg9[%c0_25, %c0_26], %43 {strides = array<i32>} : memref<8x128xf32, #tpu.memory_space<vmem>>, vector<8x128xf32>,
    } else {
    }
    return
  }
  func.func @transform_0(%arg0: i32, %arg1: i32) -> i32 {
    %c0_i32 = arith.constant 0 : i32
    %c0_i32_0 = arith.constant 0 : i32
    return %c0_i32 : i32
  }
  func.func @transform_1(%arg0: i32, %arg1: i32) -> (i32, i32) {
    %c0_i32 = arith.constant 0 : i32
    %c0_i32_0 = arith.constant 0 : i32
    return %arg0, %c0_i32 : i32, i32
  }
  func.func @transform_2(%arg0: i32, %arg1: i32) -> (i32, i32) {
    %c0_i32 = arith.constant 0 : i32
    %c0_i32_0 = arith.constant 0 : i32
    return %arg1, %c0_i32 : i32, i32
  }
  func.func @transform_3(%arg0: i32, %arg1: i32) -> (i32, i32) {
    %c0_i32 = arith.constant 0 : i32
    %c0_i32_0 = arith.constant 0 : i32
    return %arg0, %c0_i32 : i32, i32
  }
  func.func @transform_4(%arg0: i32, %arg1: i32) -> (i32, i32) {
    %c0_i32 = arith.constant 0 : i32
    %c0_i32_0 = arith.constant 0 : i32
    return %c0_i32, %arg1 : i32, i32
  }
  func.func @transform_5(%arg0: i32, %arg1: i32) -> (i32, i32) {
    %c0_i32 = arith.constant 0 : i32
    %c0_i32_0 = arith.constant 0 : i32
    return %arg0, %c0_i32 : i32, i32
  }
  func.func @transform_6(%arg0: i32, %arg1: i32) -> (i32, i32) {
    %c0_i32 = arith.constant 0 : i32
    %c0_i32_0 = arith.constant 0 : i32
    return %arg1, %c0_i32 : i32, i32
  }
  func.func @transform_7(%arg0: i32, %arg1: i32) -> (i32, i32) {
    %c0_i32 = arith.constant 0 : i32
    %c0_i32_0 = arith.constant 0 : i32
    return %arg0, %c0_i32 : i32, i32
  }
}

</mosaic_0001>

<bundles_post_ra>
// kernel: tpu_custom_call.1
= control target key start
LH: loop header
LB: loop body
LE: loop exit
PB: predicated region body
PF: predicated region fallthrough
CT: control target
= control target key end

     0   :  { %vm81_vm0 = vcmask 261120   ;;  %s1386_s0 = inlined_call_operand.<no memory space> [shape: f32[1], index: 0, kind: input, shape index: {}]   ;;  %s1387_s1 = inlined_call_operand.vmem [shape: f32[128,32], index: 1, kind: input, shape index: {}]   ;;  %s1388_s2 = inlined_call_operand.vmem [shape: f32[128,32], index: 2, kind: input, shape index: {}]   ;;  %s1389_s3 = inlined_call_operand.vmem [shape: f32[128,1], index: 3, kind: input, shape index: {}]   ;;  %s1390_s4 = inlined_call_operand.vmem [shape: f32[1,128], index: 4, kind: input, shape index: {}]   ;;  %s1391_s5 = inlined_call_operand.vmem [shape: f32[128,128], index: 5, kind: input, shape index: {}]   ;;  %s1392_s6 = inlined_call_operand.vmem [shape: f32[128,128], index: 6, kind: input, shape index: {}]   ;;  %s1393_s7 = inlined_call_operand.hbm [shape: f32[8,128], index: 7, kind: output, shape index: {}]  }
   0x1   :  { %v80_v0 = vld [vmem:[%s1388_s2 + $0x78] sm:$0xff]  ;;  %v79_v1 = vld [vmem:[%s1388_s2 + $0x70] sm:$0xff] }
   0x2   :  { %791 = vmatpush.xpose.msk.msra.mxu0 %vm81_vm0, %v80_v0  ;;  %823 = vmatpush.xpose.msk.msra.mxu2 %vm81_vm0, %v80_v0 }
   0x3   :  { %824 = vmatpush.xpose.msk.msra.mxu3 %vm81_vm0, %v80_v0 }
   0x4   :  { %13 = vsyncpa [#allocation5], 0  ;;  %v78_v2 = vld [vmem:[%s1388_s2 + $0x68] sm:$0xff]  ;;  %v77_v3 = vld [vmem:[%s1388_s2 + $0x60] sm:$0xff]  ;;  %v953_v6 = vmov 0   ;;  %s782_s13 = sshll.u32 %s1393_s7, 4  ;;  %s783_s13 = int_to_ptr.hbm [resolvable:$true] %s782_s13 }
   0x5   :  { %v76_v4 = vld [vmem:[%s1388_s2 + $0x58] sm:$0xff]  ;;  %v245_v5 = vld [vmem:[%s1389_s3 + $0x10] sm:$0xff]  ;;  %891 = vset.pattern.permute.xlu0 %v953_v6  ;;  %892 = vset.pattern.permute.xlu1 %v953_v6  ;;  %v74_v8 = vld [vmem:[%s1388_s2 + $0x48] sm:$0xff]  ;;  %s954_s14 = smov [#allocation4]  }
   0x6   :  { %792 = vmatpush.xpose.msk.msra.mxu0 %vm81_vm0, %v79_v1  ;;  %825 = vmatpush.xpose.msk.msra.mxu2 %vm81_vm0, %v79_v1  ;;  %v75_v7 = vld [vmem:[%s1388_s2 + $0x50] sm:$0xff]  ;;  %v247_v9 = vld [vmem:[%s1389_s3 + $0x20] sm:$0xff]  ;;  %v246_v10 = vld [vmem:[%s1389_s3 + $0x18] sm:$0xff] }
   0x7   :  { %826 = vmatpush.xpose.msk.msra.mxu3 %vm81_vm0, %v79_v1  ;;  %272 = vperm.xlu0 %891, %v245_v5   ;;  %v73_v11 = vld [vmem:[%s1388_s2 + $0x40] sm:$0xff]  ;;  %v72_v12 = vld [vmem:[%s1388_s2 + $0x38] sm:$0xff]  ;;  %v248_v13 = vld [vmem:[%s1389_s3 + $0x28] sm:$0xff] }
   0x8   :  { %893 = vset.pattern.permute.xlu2 %v953_v6  ;;  %282 = vperm.xlu1 %892, %v247_v9   ;;  %v251_v14 = vld [vmem:[%s1389_s3 + $0x40] sm:$0xff]  ;;  %v71_v15 = vld [vmem:[%s1388_s2 + $0x30] sm:$0xff]  ;;  %v70_v16 = vld [vmem:[%s1388_s2 + $0x28] sm:$0xff] }
   0x9   :  { %v244_v17 = vld [vmem:[%s1389_s3 + $0x8] sm:$0xff]  ;;  %v243_v18 = vld [vmem:[%s1389_s3] sm:$0xff]  ;;  %v68_v20 = vld [vmem:[%s1388_s2 + $0x18] sm:$0xff] }
   0xa   :  { %793 = vmatpush.xpose.msk.msra.mxu0 %vm81_vm0, %v78_v2  ;;  %827 = vmatpush.xpose.msk.msra.mxu2 %vm81_vm0, %v78_v2  ;;  %v69_v19 = vld [vmem:[%s1388_s2 + $0x20] sm:$0xff]  ;;  %v254_v21 = vld [vmem:[%s1389_s3 + $0x58] sm:$0xff]  ;;  %v249_v22 = vld [vmem:[%s1389_s3 + $0x30] sm:$0xff] }
   0xb   :  { %828 = vmatpush.xpose.msk.msra.mxu3 %vm81_vm0, %v78_v2  ;;  %v253_v23 = vld [vmem:[%s1389_s3 + $0x50] sm:$0xff]  ;;  %292 = vperm.xlu2 %893, %v249_v22   ;;  %v66_v25 = vld [vmem:[%s1388_s2 + $0x8] sm:$0xff]  ;;  %v258_v26 = vld [vmem:[%s1389_s3 + $0x78] sm:$0xff] }
   0xc   :  { %v67_v24 = vld [vmem:[%s1388_s2 + $0x10] sm:$0xff]  ;;  %v250_v27 = vld [vmem:[%s1389_s3 + $0x38] sm:$0xff]  ;;  %v65_v29 = vld [vmem:[%s1388_s2] sm:$0xff] }
   0xd   :  { %v257_v28 = vld [vmem:[%s1389_s3 + $0x70] sm:$0xff]  ;;  %v49_v30 = vld [vmem:[%s1387_s1] sm:$0xff]  ;;  %v54_v31 = vld [vmem:[%s1387_s1 + $0x28] sm:$0xff] }
   0xe   :  { %794 = vmatpush.xpose.msk.msra.mxu0 %vm81_vm0, %v77_v3  ;;  %829 = vmatpush.xpose.msk.msra.mxu2 %vm81_vm0, %v77_v3  ;;  %v61_v32 = vld [vmem:[%s1387_s1 + $0x60] sm:$0xff]  ;;  %v252_v33 = vld [vmem:[%s1389_s3 + $0x48] sm:$0xff]  ;;  %v55_v35 = vld [vmem:[%s1387_s1 + $0x30] sm:$0xff] }
   0xf   :  { %830 = vmatpush.xpose.msk.msra.mxu3 %vm81_vm0, %v77_v3  ;;  %277 = vperm.xlu0 %891, %v246_v10   ;;  %v50_v34 = vld [vmem:[%s1387_s1 + $0x8] sm:$0xff]  ;;  %v51_v38 = vld [vmem:[%s1387_s1 + $0x10] sm:$0xff]  ;;  %v56_v39 = vld [vmem:[%s1387_s1 + $0x38] sm:$0xff] }
  0x10   :  { %287 = vperm.xlu1 %892, %v248_v13   ;;  %v62_v36 = vld [vmem:[%s1387_s1 + $0x68] sm:$0xff]  ;;  %v63_v40 = vld [vmem:[%s1387_s1 + $0x70] sm:$0xff]  ;;  %v255_v41 = vld [vmem:[%s1389_s3 + $0x60] sm:$0xff] }
  0x11   :  { %v256_v37 = vld [vmem:[%s1389_s3 + $0x68] sm:$0xff]  ;;  %v52_v42 = vld [vmem:[%s1387_s1 + $0x18] sm:$0xff]  ;;  %v57_v43 = vld [vmem:[%s1387_s1 + $0x40] sm:$0xff] }
  0x12   :  { %795 = vmatpush.xpose.msk.msra.mxu0 %vm81_vm0, %v76_v4  ;;  %831 = vmatpush.xpose.msk.msra.mxu2 %vm81_vm0, %v76_v4  ;;  %v64_v44 = vld [vmem:[%s1387_s1 + $0x78] sm:$0xff]  ;;  %v53_v45 = vld [vmem:[%s1387_s1 + $0x20] sm:$0xff]  ;;  %v58_v46 = vld [vmem:[%s1387_s1 + $0x48] sm:$0xff] }
  0x13   :  { %832 = vmatpush.xpose.msk.msra.mxu3 %vm81_vm0, %v76_v4  ;;  %297 = vperm.xlu2 %893, %v250_v27   ;;  %v59_v47 = vld [vmem:[%s1387_s1 + $0x50] sm:$0xff]  ;;  %v60_v48 = vld [vmem:[%s1387_s1 + $0x58] sm:$0xff]  ;;  %v581_v51 = vld [vmem:[%s1392_s6 + $0x68] sm:$0xff] }
  0x14   :  { %v583_v49 = vld [vmem:[%s1392_s6 + $0x78] sm:$0xff]  ;;  %v582_v50 = vld [vmem:[%s1392_s6 + $0x70] sm:$0xff]  ;;  %v580_v52 = vld [vmem:[%s1392_s6 + $0x60] sm:$0xff] }
  0x15   :  { %855 = vmatpush.msra.mxu1 %v583_v49  ;;  %v579_v53 = vld [vmem:[%s1392_s6 + $0x58] sm:$0xff]  ;;  %v578_v54 = vld [vmem:[%s1392_s6 + $0x50] sm:$0xff]  ;;  %v577_v57 = vld [vmem:[%s1392_s6 + $0x48] sm:$0xff] }
  0x16   :  { %796 = vmatpush.xpose.msk.msra.mxu0 %vm81_vm0, %v75_v7  ;;  %833 = vmatpush.xpose.msk.msra.mxu2 %vm81_vm0, %v75_v7  ;;  %v576_v59 = vld [vmem:[%s1392_s6 + $0x40] sm:$0xff]  ;;  %v575_v60 = vld [vmem:[%s1392_s6 + $0x38] sm:$0xff]  ;;  %v574_v61 = vld [vmem:[%s1392_s6 + $0x30] sm:$0xff] }
  0x17   :  { %834 = vmatpush.xpose.msk.msra.mxu3 %vm81_vm0, %v75_v7  ;;  %302 = vperm.xlu0 %891, %v251_v14   ;;  %v573_v62 = vld [vmem:[%s1392_s6 + $0x28] sm:$0xff]  ;;  %v572_v1 = vld [vmem:[%s1392_s6 + $0x20] sm:$0xff]  ;;  %v571_v3 = vld [vmem:[%s1392_s6 + $0x18] sm:$0xff]  ;;  %v1274_v14 = vstv %s1386_s0 }
  0x18   :  { %262 = vperm.xlu1 %892, %v243_v18   ;;  %857 = vmatpush.msra.mxu1 %v582_v50  ;;  %v570_v4 = vld [vmem:[%s1392_s6 + $0x10] sm:$0xff]  ;;  %v569_v5 = vld [vmem:[%s1392_s6 + $0x8] sm:$0xff]  ;;  %v1261_v6 = vld [vmem:[%s1390_s4] ss:$0 sm:$0xff] }
  0x19   :  { %v568_v7 = vld [vmem:[%s1392_s6] sm:$0xff] }
  0x1a   :  { %797 = vmatpush.xpose.msk.msra.mxu0 %vm81_vm0, %v74_v8  ;;  %835 = vmatpush.xpose.msk.msra.mxu2 %vm81_vm0, %v74_v8 }
  0x1b   :  { %836 = vmatpush.xpose.msk.msra.mxu3 %vm81_vm0, %v74_v8  ;;  %307 = vperm.xlu2 %893, %v252_v33  }
  0x1c   :  { %859 = vmatpush.msra.mxu1 %v581_v51 }
  0x1e   :  { %798 = vmatpush.xpose.msk.msra.mxu0 %vm81_vm0, %v73_v11  ;;  %837 = vmatpush.xpose.msk.msra.mxu2 %vm81_vm0, %v73_v11 }
  0x1f   :  { %838 = vmatpush.xpose.msk.msra.mxu3 %vm81_vm0, %v73_v11  ;;  %267 = vperm.xlu0 %891, %v244_v17  }
  0x20   :  { %312 = vperm.xlu1 %892, %v253_v23   ;;  %861 = vmatpush.msra.mxu1 %v580_v52 }
  0x22   :  { %799 = vmatpush.xpose.msk.msra.mxu0 %vm81_vm0, %v72_v12  ;;  %839 = vmatpush.xpose.msk.msra.mxu2 %vm81_vm0, %v72_v12 }
  0x23   :  { %840 = vmatpush.xpose.msk.msra.mxu3 %vm81_vm0, %v72_v12  ;;  %327 = vperm.xlu2 %893, %v256_v37  }
  0x24   :  { %863 = vmatpush.msra.mxu1 %v579_v53 }
  0x26   :  { %800 = vmatpush.xpose.msk.msra.mxu0 %vm81_vm0, %v71_v15  ;;  %841 = vmatpush.xpose.msk.msra.mxu2 %vm81_vm0, %v71_v15 }
  0x27   :  { %842 = vmatpush.xpose.msk.msra.mxu3 %vm81_vm0, %v71_v15  ;;  %317 = vperm.xlu0 %891, %v254_v21  }
  0x28   :  { %332 = vperm.xlu1 %892, %v257_v28   ;;  %865 = vmatpush.msra.mxu1 %v578_v54 }
  0x2a   :  { %801 = vmatpush.xpose.msk.msra.mxu0 %vm81_vm0, %v70_v16  ;;  %843 = vmatpush.xpose.msk.msra.mxu2 %vm81_vm0, %v70_v16 }
  0x2b   :  { %844 = vmatpush.xpose.msk.msra.mxu3 %vm81_vm0, %v70_v16  ;;  %322 = vperm.xlu2 %893, %v255_v41  }
  0x2c   :  { %867 = vmatpush.msra.mxu1 %v577_v57 }
  0x2e   :  { %802 = vmatpush.xpose.msk.msra.mxu0 %vm81_vm0, %v69_v19  ;;  %845 = vmatpush.xpose.msk.msra.mxu2 %vm81_vm0, %v69_v19 }
  0x2f   :  { %846 = vmatpush.xpose.msk.msra.mxu3 %vm81_vm0, %v69_v19  ;;  %337 = vperm.xlu0 %891, %v258_v26  }
  0x30   :  { %869 = vmatpush.msra.mxu1 %v576_v59 }
  0x32   :  { %803 = vmatpush.xpose.msk.msra.mxu0 %vm81_vm0, %v68_v20  ;;  %847 = vmatpush.xpose.msk.msra.mxu2 %vm81_vm0, %v68_v20 }
  0x33   :  { %848 = vmatpush.xpose.msk.msra.mxu3 %vm81_vm0, %v68_v20  ;;  %871 = vmatpush.msra.mxu1 %v575_v60 }
  0x35   :  { %873 = vmatpush.msra.mxu1 %v574_v61 }
  0x36   :  { %804 = vmatpush.xpose.msk.msra.mxu0 %vm81_vm0, %v67_v24  ;;  %849 = vmatpush.xpose.msk.msra.mxu2 %vm81_vm0, %v67_v24 }
  0x37   :  { %850 = vmatpush.xpose.msk.msra.mxu3 %vm81_vm0, %v67_v24  ;;  %875 = vmatpush.msra.mxu1 %v573_v62 }
  0x39   :  { %877 = vmatpush.msra.mxu1 %v572_v1 }
  0x3a   :  { %805 = vmatpush.xpose.msk.msra.mxu0 %vm81_vm0, %v66_v25  ;;  %851 = vmatpush.xpose.msk.msra.mxu2 %vm81_vm0, %v66_v25 }
  0x3b   :  { %852 = vmatpush.xpose.msk.msra.mxu3 %vm81_vm0, %v66_v25  ;;  %879 = vmatpush.msra.mxu1 %v571_v3 }
  0x3d   :  { %881 = vmatpush.msra.mxu1 %v570_v4 }
  0x3e   :  { %806 = vmatpush.xpose.msk.msra.mxu0 %vm81_vm0, %v65_v29  ;;  %853 = vmatpush.xpose.msk.msra.mxu2 %vm81_vm0, %v65_v29 }
  0x3f   :  { %854 = vmatpush.xpose.msk.msra.mxu3 %vm81_vm0, %v65_v29  ;;  %883 = vmatpush.msra.mxu1 %v569_v5 }
  0x41   :  { %807 = vmatmul.msk.f32.vlgmr.msra.gmra.mxu0 %vm81_vm0, %v49_v30  ;;  %812 = vmatmul.msk.f32.vlgmr.msra.gmra.mxu2 %vm81_vm0, %v54_v31 }
  0x42   :  { %819 = vmatmul.msk.f32.vlgmr.msra.gmra.mxu3 %vm81_vm0, %v61_v32  ;;  %584 = vmatpush.msrb.mxu0 %v583_v49 }
  0x43   :  { %856 = vmatpush.msrb.mxu3 %v583_v49  ;;  %885 = vmatpush.msra.mxu1 %v568_v7 }
  0x44   :  { %585 = vmatpush.msrb.mxu0 %v582_v50 }
  0x45   :  { %858 = vmatpush.msrb.mxu3 %v582_v50 }
  0x46   :  { %586 = vmatpush.msrb.mxu0 %v581_v51 }
  0x47   :  { %860 = vmatpush.msrb.mxu3 %v581_v51 }
  0x48   :  { %587 = vmatpush.msrb.mxu0 %v580_v52 }
  0x49   :  { %808 = vmatmul.msk.f32.gmra.mxu0 %vm81_vm0, %v50_v34  ;;  %813 = vmatmul.msk.f32.gmra.mxu2 %vm81_vm0, %v55_v35 }
  0x4a   :  { %820 = vmatmul.msk.f32.gmra.mxu3 %vm81_vm0, %v62_v36  ;;  %588 = vmatpush.msrb.mxu0 %v579_v53 }
  0x4b   :  { %862 = vmatpush.msrb.mxu3 %v580_v52 }
  0x4c   :  { %589 = vmatpush.msrb.mxu0 %v578_v54 }
  0x4d   :  { %864 = vmatpush.msrb.mxu3 %v579_v53 }
  0x4e   :  { %590 = vmatpush.msrb.mxu0 %v577_v57 }
  0x4f   :  { %866 = vmatpush.msrb.mxu3 %v578_v54 }
  0x50   :  { %591 = vmatpush.msrb.mxu0 %v576_v59 }
  0x51   :  { %809 = vmatmul.msk.f32.gmra.mxu0 %vm81_vm0, %v51_v38  ;;  %814 = vmatmul.msk.f32.gmra.mxu2 %vm81_vm0, %v56_v39 }
  0x52   :  { %821 = vmatmul.msk.f32.gmra.mxu3 %vm81_vm0, %v63_v40  ;;  %592 = vmatpush.msrb.mxu0 %v575_v60 }
  0x53   :  { %868 = vmatpush.msrb.mxu3 %v577_v57 }
  0x54   :  { %593 = vmatpush.msrb.mxu0 %v574_v61 }
  0x55   :  { %870 = vmatpush.msrb.mxu3 %v576_v59 }
  0x56   :  { %594 = vmatpush.msrb.mxu0 %v573_v62 }
  0x57   :  { %872 = vmatpush.msrb.mxu3 %v575_v60 }
  0x58   :  { %595 = vmatpush.msrb.mxu0 %v572_v1 }
  0x59   :  { %810 = vmatmul.msk.f32.gmra.mxu0 %vm81_vm0, %v52_v42  ;;  %815 = vmatmul.msk.f32.gmra.mxu2 %vm81_vm0, %v57_v43 }
  0x5a   :  { %822 = vmatmul.msk.f32.gmra.mxu3 %vm81_vm0, %v64_v44  ;;  %596 = vmatpush.msrb.mxu0 %v571_v3 }
  0x5b   :  { %874 = vmatpush.msrb.mxu3 %v574_v61 }
  0x5c   :  { %597 = vmatpush.msrb.mxu0 %v570_v4 }
  0x5d   :  { %876 = vmatpush.msrb.mxu3 %v573_v62 }
  0x5e   :  { %598 = vmatpush.msrb.mxu0 %v569_v5 }
  0x5f   :  { %878 = vmatpush.msrb.mxu3 %v572_v1 }
  0x60   :  { %599 = vmatpush.msrb.mxu0 %v568_v7 }
  0x61   :  { %811 = vmatmul.msk.f32.gmra.mxu0 %vm81_vm0, %v53_v45  ;;  %816 = vmatmul.msk.f32.gmra.mxu2 %vm81_vm0, %v58_v46 }
  0x62   :  { %880 = vmatpush.msrb.mxu3 %v571_v3 }
  0x64   :  { %882 = vmatpush.msrb.mxu3 %v570_v4 }
  0x65   :  { %v1228_v58 = vpop.permute.xlu2 %292 }
  0x66   :  { %884 = vmatpush.msrb.mxu3 %v569_v5 }
  0x68   :  { %886 = vmatpush.msrb.mxu3 %v568_v7 }
  0x69   :  { %817 = vmatmul.msk.f32.gmra.mxu2 %vm81_vm0, %v59_v47 }
  0x6d   :  { %v1247_v2 = vpop.permute.xlu2 %297 }
  0x71   :  { %818 = vmatmul.msk.f32.gmra.mxu2 %vm81_vm0, %v60_v48 }
  0x75   :  { %v1268_v10 = vpop.permute.xlu2 %307 }
  0x79   :  { %v1221_v55 = vpop.permute.xlu0 %272 }
  0x7a   :  { %v1223_v56 = vpop.permute.xlu1 %282  ;;  %v345_v28 = vadd.f32 %v1261_v6, %v1221_v55 }
  0x7d   :  { %v328_v20 = vpop.permute.xlu2 %327 }
  0x7e   :  { %v356_v27 = vadd.f32 %v1261_v6, %v328_v20 }
  0x81   :  { %v1242_v63 = vpop.permute.xlu0 %277 }
  0x82   :  { %v288_v0 = vpop.permute.xlu1 %287  ;;  %v346_v1 = vadd.f32 %v1261_v6, %v1242_v63 }
  0x83   :  { %v348_v30 = vadd.f32 %v1261_v6, %v288_v0 }
  0x85   :  { %v323_v32 = vpop.permute.xlu2 %322 }
  0x86   :  { %v355_v36 = vadd.f32 %v1261_v6, %v323_v32 }
  0x89   :  { %v1266_v8 = vpop.permute.xlu0 %302 }
  0x8a   :  { %v263_v9 = vpop.permute.xlu1 %262 }
  0x8b   :  { %v343_v11 = vadd.f32 %v1261_v6, %v263_v9 }
  0x91   :  { %v268_v16 = vpop.permute.xlu0 %267 }
  0x92   :  { %v344_v17 = vadd.f32 %v1261_v6, %v268_v16  ;;  %v1278_v23 = vpop.permute.xlu1 %312 }
  0x99   :  { %v1288_v38 = vpop.permute.xlu0 %317 }
  0x9a   :  { %v333_v42 = vpop.permute.xlu1 %332 }
  0x9b   :  { %v357_v51 = vadd.f32 %v1261_v6, %v333_v42 }
  0xbe   :  { %v195_v12 = vpop.f32.mrf.mxu0 }
  0xbf   :  { %v359_v13 = vadd.f32 %v343_v11, %v195_v12 }
  0xc1   :  { %v375_v15 = vmax.f32 %v359_v13, 0.0 }
  0xc3   :  { %v392_v18 = vmul.f32 %v1274_v14, %v375_v15  ;;  %v338_v15 = vpop.permute.xlu0 %337 }
  0xc4   :  { %v210_v19 = vpop.f32.mrf.mxu2 }
  0xc5   :  { %v408_v21 = vmul.f32 1.442695, %v392_v18  ;;  %v231_v22 = vpop.f32.mrf.mxu3  ;;  %v364_v44 = vadd.f32 %v348_v30, %v210_v19  ;;  %v349_v19 = vadd.f32 %v1261_v6, %v1228_v58 }
  0xc6   :  { %v198_v24 = vpop.f32.mrf.mxu0  ;;  %v371_v43 = vadd.f32 %v355_v36, %v231_v22 }
  0xc7   :  { %895 = vpow2.f32 %v408_v21  ;;  %v360_v25 = vadd.f32 %v344_v17, %v198_v24  ;;  %v380_v57 = vmax.f32 %v364_v44, 0.0  ;;  %v347_v24 = vadd.f32 %v1261_v6, %v1223_v56 }
  0xc8   :  { %v387_v49 = vmax.f32 %v371_v43, 0.0 }
  0xc9   :  { %v376_v26 = vmax.f32 %v360_v25, 0.0  ;;  %v397_v13 = vmul.f32 %v1274_v14, %v380_v57  ;;  %v351_v25 = vadd.f32 %v1261_v6, %v1266_v8 }
  0xca   :  { %v1294_v55 = vmul.f32 %v1274_v14, %v387_v49 }
  0xcb   :  { %v393_v29 = vmul.f32 %v1274_v14, %v376_v26  ;;  %v358_v26 = vadd.f32 %v1261_v6, %v338_v15 }
  0xcc   :  { %v1285_v31 = vpop.f32.mrf.mxu2 }
  0xcd   :  { %v896_v33 = vpop.eup %895  ;;  %v410_v34 = vmul.f32 1.442695, %v393_v29  ;;  %v234_v35 = vpop.f32.mrf.mxu3  ;;  %v418_v29 = vmul.f32 1.442695, %v397_v13 }
  0xce   :  { %v440_v37 = vmul.f32 %v896_v33, %v896_v33  ;;  %v372_v39 = vadd.f32 %v356_v27, %v234_v35  ;;  %v201_v40 = vpop.f32.mrf.mxu0  ;;  %v365_v35 = vadd.f32 %v349_v19, %v1285_v31  ;;  %v352_v31 = vadd.f32 %v1261_v6, %v1268_v10 }
  0xcf   :  { %897 = vpow2.f32 %v410_v34  ;;  %v361_v41 = vadd.f32 %v345_v28, %v201_v40 }
  0xd0   :  { %v388_v45 = vmax.f32 %v372_v39, 0.0  ;;  %v456_v46 = vadd.f32 %v896_v33, %v440_v37  ;;  %v472_v47 = vmul.f32 %v440_v37, %v440_v37 }
  0xd1   :  { %v377_v48 = vmax.f32 %v361_v41, 0.0 }
  0xd2   :  { %v405_v50 = vmul.f32 %v1274_v14, %v388_v45  ;;  %v488_v52 = vadd.f32 %v472_v47, %v456_v46  ;;  %v504_v53 = vmul.f32 %v472_v47, %v472_v47 }
  0xd3   :  { %v394_v54 = vmul.f32 %v1274_v14, %v377_v48 }
  0xd4   :  { %v434_v59 = vmul.f32 1.442695, %v405_v50  ;;  %v1296_v60 = vpop.f32.mrf.mxu2  ;;  %v520_v61 = vadd.f32 %v504_v53, %v488_v52  ;;  %v536_v62 = vmul.f32 %v504_v53, %v504_v53  ;;  %v381_v50 = vmax.f32 %v365_v35, 0.0 }
  0xd5   :  { %v898_v0 = vpop.eup %897  ;;  %v412_v3 = vmul.f32 1.442695, %v394_v54  ;;  %v237_v4 = vpop.f32.mrf.mxu3 }
  0xd6   :  { %899 = vpow2.f32 %v434_v59  ;;  %v373_v5 = vadd.f32 %v357_v51, %v237_v4  ;;  %v204_v7 = vpop.f32.mrf.mxu0  ;;  %v552_v9 = vadd.f32 %v536_v62, %v520_v61  ;;  %v441_v11 = vmul.f32 %v898_v0, %v898_v0 }
  0xd7   :  { %901 = vpow2.f32 %v412_v3  ;;  %v362_v12 = vadd.f32 %v346_v1, %v204_v7  ;;  %v350_v61 = vadd.f32 %v1261_v6, %v1247_v2 }
  0xd8   :  { %v389_v16 = vmax.f32 %v373_v5, 0.0  ;;  %600 = vmatmul.f32.vlgmr.msrb.gmra.mxu0 %v552_v9  ;;  %v457_v17 = vadd.f32 %v898_v0, %v441_v11  ;;  %v473_v18 = vmul.f32 %v441_v11, %v441_v11  ;;  %v398_v9 = vmul.f32 %v1274_v14, %v381_v50 }
  0xd9   :  { %v378_v63 = vmax.f32 %v362_v12, 0.0  ;;  %v366_v2 = vadd.f32 %v350_v61, %v1296_v60 }
  0xda   :  { %v406_v20 = vmul.f32 %v1274_v14, %v389_v16  ;;  %v489_v21 = vadd.f32 %v473_v18, %v457_v17  ;;  %v505_v22 = vmul.f32 %v473_v18, %v473_v18  ;;  %v420_v60 = vmul.f32 1.442695, %v398_v9 }
  0xdb   :  { %v395_v27 = vmul.f32 %v1274_v14, %v378_v63 }
  0xdc   :  { %v900_v28 = vpop.eup %899  ;;  %v436_v30 = vmul.f32 1.442695, %v406_v20  ;;  %v219_v32 = vpop.f32.mrf.mxu2  ;;  %v521_v58 = vadd.f32 %v505_v22, %v489_v21  ;;  %v537_v33 = vmul.f32 %v505_v22, %v505_v22 }
  0xdd   :  { %v902_v34 = vpop.eup %901  ;;  %v453_v36 = vmul.f32 %v900_v28, %v900_v28  ;;  %v414_v37 = vmul.f32 1.442695, %v395_v27  ;;  %v367_v39 = vadd.f32 %v351_v25, %v219_v32  ;;  %v240_v56 = vpop.f32.mrf.mxu3  ;;  %v353_v27 = vadd.f32 %v1261_v6, %v1278_v23 }
  0xde   :  { %903 = vpow2.f32 %v436_v30  ;;  %v374_v40 = vadd.f32 %v358_v26, %v240_v56  ;;  %v207_v8 = vpop.f32.mrf.mxu0  ;;  %v553_v41 = vadd.f32 %v537_v33, %v521_v58  ;;  %v442_v42 = vmul.f32 %v902_v34, %v902_v34 }
  0xdf   :  { %905 = vpow2.f32 %v414_v37  ;;  %v383_v43 = vmax.f32 %v367_v39, 0.0  ;;  %v363_v44 = vadd.f32 %v347_v24, %v207_v8  ;;  %v469_v45 = vadd.f32 %v900_v28, %v453_v36 }
  0xe0   :  { %v390_v46 = vmax.f32 %v374_v40, 0.0  ;;  %603 = vmatmul.f32.gmra.mxu0 %v553_v41  ;;  %v485_v47 = vmul.f32 %v453_v36, %v453_v36  ;;  %v458_v48 = vadd.f32 %v902_v34, %v442_v42  ;;  %v474_v49 = vmul.f32 %v442_v42, %v442_v42 }
  0xe1   :  { %v1314_v51 = vmul.f32 %v1274_v14, %v383_v43  ;;  %v379_v52 = vmax.f32 %v363_v44, 0.0  ;;  %907 = vpow2.f32 %v418_v29  ;;  %v382_v30 = vmax.f32 %v366_v2, 0.0 }
  0xe2   :  { %v407_v53 = vmul.f32 %v1274_v14, %v390_v46  ;;  %v501_v54 = vadd.f32 %v485_v47, %v469_v45  ;;  %v517_v57 = vmul.f32 %v485_v47, %v485_v47  ;;  %v490_v59 = vadd.f32 %v474_v49, %v458_v48 }
  0xe3   :  { %v396_v62 = vmul.f32 %v1274_v14, %v379_v52  ;;  %v506_v0 = vmul.f32 %v474_v49, %v474_v49  ;;  %v399_v23 = vmul.f32 %v1274_v14, %v382_v30 }
  0xe4   :  { %v904_v1 = vpop.eup %903  ;;  %v438_v3 = vmul.f32 1.442695, %v407_v53  ;;  %v222_v10 = vpop.f32.mrf.mxu2  ;;  %v533_v4 = vadd.f32 %v517_v57, %v501_v54  ;;  %v549_v5 = vmul.f32 %v517_v57, %v517_v57  ;;  %v354_v57 = vadd.f32 %v1261_v6, %v1288_v38 }
  0xe5   :  { %v906_v7 = vpop.eup %905  ;;  %v416_v11 = vmul.f32 1.442695, %v396_v62  ;;  %v368_v12 = vadd.f32 %v352_v31, %v222_v10  ;;  %v522_v13 = vadd.f32 %v506_v0, %v490_v59  ;;  %v538_v16 = vmul.f32 %v506_v0, %v506_v0 }
  0xe6   :  { %909 = vpow2.f32 %v438_v3  ;;  %v565_v15 = vadd.f32 %v549_v5, %v533_v4  ;;  %v454_v17 = vmul.f32 %v904_v1, %v904_v1  ;;  %v443_v19 = vmul.f32 %v906_v7, %v906_v7 }
  0xe7   :  { %911 = vpow2.f32 %v416_v11  ;;  %v384_v18 = vmax.f32 %v368_v12, 0.0  ;;  %v554_v63 = vadd.f32 %v538_v16, %v522_v13  ;;  %v908_v26 = vpop.eup %907  ;;  %v422_v59 = vmul.f32 1.442695, %v399_v23 }
  0xe8   :  { %639 = vmatmul.f32.vlgmr.msrb.gmra.mxu3 %v565_v15  ;;  %v470_v20 = vadd.f32 %v904_v1, %v454_v17  ;;  %v486_v21 = vmul.f32 %v454_v17, %v454_v17  ;;  %v459_v24 = vadd.f32 %v906_v7, %v443_v19  ;;  %v475_v25 = vmul.f32 %v443_v19, %v443_v19 }
  0xe9   :  { %v1323_v22 = vmul.f32 %v1274_v14, %v384_v18  ;;  %606 = vmatmul.f32.vlgmr.msra.gmra.mxu1 %v554_v63  ;;  %v445_v43 = vmul.f32 %v908_v26, %v908_v26  ;;  %913 = vpow2.f32 %v420_v60  ;;  %v424_v38 = vmul.f32 1.442695, %v1314_v51 }
  0xea   :  { %v502_v28 = vadd.f32 %v486_v21, %v470_v20  ;;  %v518_v29 = vmul.f32 %v486_v21, %v486_v21  ;;  %v491_v32 = vadd.f32 %v475_v25, %v459_v24  ;;  %v507_v58 = vmul.f32 %v475_v25, %v475_v25 }
  0xeb   :  { %v461_v61 = vadd.f32 %v908_v26, %v445_v43  ;;  %v477_v62 = vmul.f32 %v445_v43, %v445_v43  ;;  %915 = vpow2.f32 %v422_v59  ;;  %v426_v26 = vmul.f32 1.442695, %v1323_v22 }
  0xec   :  { %v910_v33 = vpop.eup %909  ;;  %v225_v34 = vpop.f32.mrf.mxu2  ;;  %v534_v35 = vadd.f32 %v518_v29, %v502_v28  ;;  %v550_v36 = vmul.f32 %v518_v29, %v518_v29  ;;  %v523_v56 = vadd.f32 %v507_v58, %v491_v32  ;;  %v539_v40 = vmul.f32 %v507_v58, %v507_v58 }
  0xed   :  { %v912_v37 = vpop.eup %911  ;;  %v369_v39 = vadd.f32 %v353_v27, %v225_v34  ;;  %v455_v41 = vmul.f32 %v910_v33, %v910_v33  ;;  %v493_v13 = vadd.f32 %v477_v62, %v461_v61  ;;  %v509_v15 = vmul.f32 %v477_v62, %v477_v62 }
  0xee   :  { %v566_v8 = vadd.f32 %v550_v36, %v534_v35  ;;  %v444_v42 = vmul.f32 %v912_v37, %v912_v37  ;;  %v555_v45 = vadd.f32 %v539_v40, %v523_v56  ;;  %917 = vpow2.f32 %v424_v38 }
  0xef   :  { %v385_v44 = vmax.f32 %v369_v39, 0.0  ;;  %v471_v46 = vadd.f32 %v910_v33, %v455_v41  ;;  %v487_v47 = vmul.f32 %v455_v41, %v455_v41  ;;  %v914_v5 = vpop.eup %913  ;;  %v525_v17 = vadd.f32 %v509_v15, %v493_v13 }
  0xf0   :  { %642 = vmatmul.f32.gmra.mxu3 %v566_v8  ;;  %v460_v48 = vadd.f32 %v912_v37, %v444_v42  ;;  %v476_v49 = vmul.f32 %v444_v42, %v444_v42  ;;  %v446_v16 = vmul.f32 %v914_v5, %v914_v5  ;;  %v541_v2 = vmul.f32 %v509_v15, %v509_v15 }
  0xf1   :  { %v402_v31 = vmul.f32 %v1274_v14, %v385_v44  ;;  %609 = vmatmul.f32.gmra.mxu1 %v555_v45  ;;  %v503_v50 = vadd.f32 %v487_v47, %v471_v46  ;;  %v519_v52 = vmul.f32 %v487_v47, %v487_v47  ;;  %v916_v63 = vpop.eup %915  ;;  %919 = vpow2.f32 %v426_v26 }
  0xf2   :  { %v492_v53 = vadd.f32 %v476_v49, %v460_v48  ;;  %v508_v54 = vmul.f32 %v476_v49, %v476_v49  ;;  %v462_v18 = vadd.f32 %v914_v5, %v446_v16  ;;  %v478_v19 = vmul.f32 %v446_v16, %v446_v16 }
  0xf3   :  { %v535_v1 = vadd.f32 %v519_v52, %v503_v50  ;;  %v551_v3 = vmul.f32 %v519_v52, %v519_v52  ;;  %v557_v20 = vadd.f32 %v541_v2, %v525_v17  ;;  %v447_v25 = vmul.f32 %v916_v63, %v916_v63 }
  0xf4   :  { %v228_v0 = vpop.f32.mrf.mxu2  ;;  %v524_v10 = vadd.f32 %v508_v54, %v492_v53  ;;  %v540_v4 = vmul.f32 %v508_v54, %v508_v54  ;;  %v494_v21 = vadd.f32 %v478_v19, %v462_v18  ;;  %v510_v24 = vmul.f32 %v478_v19, %v478_v19  ;;  %v918_v60 = vpop.eup %917 }
  0xf5   :  { %v370_v7 = vadd.f32 %v354_v57, %v228_v0  ;;  %v567_v9 = vadd.f32 %v551_v3, %v535_v1  ;;  %v463_v29 = vadd.f32 %v916_v63, %v447_v25  ;;  %v448_v58 = vmul.f32 %v918_v60, %v918_v60 }
  0xf6   :  { %v556_v11 = vadd.f32 %v540_v4, %v524_v10  ;;  %v526_v27 = vadd.f32 %v510_v24, %v494_v21  ;;  %v542_v28 = vmul.f32 %v510_v24, %v510_v24  ;;  %v428_v33 = vmul.f32 1.442695, %v402_v31 }
  0xf7   :  { %v386_v12 = vmax.f32 %v370_v7, 0.0  ;;  %v464_v36 = vadd.f32 %v918_v60, %v448_v58  ;;  %v480_v37 = vmul.f32 %v448_v58, %v448_v58  ;;  %v920_v39 = vpop.eup %919  ;;  %v432_v31 = vmul.f32 1.442695, %v1294_v55  ;;  %v700_v60 = vld [vmem:[%s1391_s5] sm:$0xff]  ;;  %v703_v58 = vld [vmem:[%s1391_s5 + $0x18] sm:$0xff] }
  0xf8   :  { %645 = vmatmul.f32.gmra.mxu3 %v567_v9  ;;  %v558_v51 = vadd.f32 %v542_v28, %v526_v27  ;;  %921 = vpow2.f32 %v428_v33  ;;  %v449_v8 = vmul.f32 %v920_v39, %v920_v39 }
  0xf9   :  { %v403_v6 = vmul.f32 %v1274_v14, %v386_v12  ;;  %612 = vmatmul.f32.gmra.mxu1 %v556_v11  ;;  %v479_v14 = vmul.f32 %v447_v25, %v447_v25  ;;  %v496_v22 = vadd.f32 %v480_v37, %v464_v36  ;;  %v512_v40 = vmul.f32 %v480_v37, %v480_v37 }
  0xfa   :  { %v465_v23 = vadd.f32 %v920_v39, %v449_v8  ;;  %v481_v44 = vmul.f32 %v449_v8, %v449_v8  ;;  %v705_v39 = vld [vmem:[%s1391_s5 + $0x28] sm:$0xff]  ;;  %v706_v8 = vld [vmem:[%s1391_s5 + $0x30] sm:$0xff] }
  0xfb   :  { %v495_v30 = vadd.f32 %v479_v14, %v463_v29  ;;  %v511_v32 = vmul.f32 %v479_v14, %v479_v14  ;;  %v430_v41 = vmul.f32 1.442695, %v403_v6  ;;  %v528_v42 = vadd.f32 %v512_v40, %v496_v22  ;;  %v701_v14 = vld [vmem:[%s1391_s5 + $0x8] sm:$0xff] }
  0xfc   :  { %v544_v43 = vmul.f32 %v512_v40, %v512_v40  ;;  %v497_v47 = vadd.f32 %v481_v44, %v465_v23  ;;  %v513_v48 = vmul.f32 %v481_v44, %v481_v44  ;;  %v707_v23 = vld [vmem:[%s1391_s5 + $0x38] sm:$0xff] }
  0xfd   :  { %v527_v34 = vadd.f32 %v511_v32, %v495_v30  ;;  %v543_v35 = vmul.f32 %v511_v32, %v511_v32  ;;  %923 = vpow2.f32 %v430_v41 }
  0xfe   :  { %v922_v45 = vpop.eup %921  ;;  %v560_v46 = vadd.f32 %v544_v43, %v528_v42  ;;  %v529_v50 = vadd.f32 %v513_v48, %v497_v47  ;;  %v545_v52 = vmul.f32 %v513_v48, %v513_v48  ;;  %925 = vpow2.f32 %v432_v31 }
  0xff   :  { %v559_v56 = vadd.f32 %v543_v35, %v527_v34  ;;  %v450_v49 = vmul.f32 %v922_v45, %v922_v45  ;;  %v704_v35 = vld [vmem:[%s1391_s5 + $0x20] sm:$0xff] }
 0x100   :  { %v561_v59 = vadd.f32 %v545_v52, %v529_v50  ;;  %v710_v52 = vld [vmem:[%s1391_s5 + $0x50] sm:$0xff] }
 0x101   :  { %615 = vmatmul.f32.gmra.mxu1 %v557_v20  ;;  %v466_v53 = vadd.f32 %v922_v45, %v450_v49  ;;  %v482_v54 = vmul.f32 %v450_v49, %v450_v49  ;;  %v709_v49 = vld [vmem:[%s1391_s5 + $0x48] sm:$0xff] }
 0x103   :  { %v924_v57 = vpop.eup %923  ;;  %v498_v61 = vadd.f32 %v482_v54, %v466_v53  ;;  %v514_v62 = vmul.f32 %v482_v54, %v482_v54 }
 0x104   :  { %v451_v0 = vmul.f32 %v924_v57, %v924_v57  ;;  %v926_v5 = vpop.eup %925 }
 0x105   :  { %v530_v1 = vadd.f32 %v514_v62, %v498_v61  ;;  %v546_v3 = vmul.f32 %v514_v62, %v514_v62  ;;  %v452_v55 = vmul.f32 %v926_v5, %v926_v5  ;;  %v711_v61 = vld [vmem:[%s1391_s5 + $0x58] sm:$0xff] }
 0x106   :  { %v467_v10 = vadd.f32 %v924_v57, %v451_v0  ;;  %v483_v4 = vmul.f32 %v451_v0, %v451_v0 }
 0x107   :  { %v562_v7 = vadd.f32 %v546_v3, %v530_v1  ;;  %v468_v15 = vadd.f32 %v926_v5, %v452_v55  ;;  %v484_v16 = vmul.f32 %v452_v55, %v452_v55  ;;  %v713_v5 = vld [vmem:[%s1391_s5 + $0x68] sm:$0xff]  ;;  %v714_v55 = vld [vmem:[%s1391_s5 + $0x70] sm:$0xff] }
 0x108   :  { %v499_v9 = vadd.f32 %v483_v4, %v467_v10  ;;  %v515_v11 = vmul.f32 %v483_v4, %v483_v4  ;;  %v712_v10 = vld [vmem:[%s1391_s5 + $0x60] sm:$0xff] }
 0x109   :  { %618 = vmatmul.f32.gmra.mxu1 %v558_v51  ;;  %v500_v38 = vadd.f32 %v484_v16, %v468_v15  ;;  %v516_v17 = vmul.f32 %v484_v16, %v484_v16  ;;  %v702_v51 = vld [vmem:[%s1391_s5 + $0x10] sm:$0xff]  ;;  %v715_v16 = vld [vmem:[%s1391_s5 + $0x78] sm:$0xff] }
 0x10a   :  { %v531_v12 = vadd.f32 %v515_v11, %v499_v9  ;;  %v547_v13 = vmul.f32 %v515_v11, %v515_v11 }
 0x10b   :  { %v532_v2 = vadd.f32 %v516_v17, %v500_v38  ;;  %v548_v18 = vmul.f32 %v516_v17, %v516_v17 }
 0x10c   :  { %v563_v6 = vadd.f32 %v547_v13, %v531_v12 }
 0x10d   :  { %v564_v19 = vadd.f32 %v548_v18, %v532_v2 }
 0x111   :  { %621 = vmatmul.f32.gmra.mxu1 %v559_v56 }
 0x119   :  { %624 = vmatmul.f32.gmra.mxu1 %v560_v46  ;;  %v708_v46 = vld [vmem:[%s1391_s5 + $0x40] sm:$0xff]  ;;  %s780_s5 = sshll.u32 %s954_s14, 4  ;;  %s781_s5 = int_to_ptr.vmem [resolvable:$true] %s780_s5 }
 0x121   :  { %627 = vmatmul.f32.gmra.mxu1 %v561_v59 }
 0x129   :  { %630 = vmatmul.f32.gmra.mxu1 %v562_v7 }
 0x131   :  { %633 = vmatmul.f32.gmra.mxu1 %v563_v6 }
 0x139   :  { %636 = vmatmul.f32.gmra.mxu1 %v564_v19 }
 0x155   :  { %v601_v27 = vpop.f32.mrf.mxu0 }
 0x156   :  { %v732_v33 = vmul.f32 %v700_v60, %v601_v27 }
 0x15d   :  { %v604_v29 = vpop.f32.mrf.mxu0 }
 0x15e   :  { %v733_v32 = vmul.f32 %v701_v14, %v604_v29 }
 0x160   :  { %v748_v36 = vadd.f32 %v733_v32, %v732_v33 }
 0x166   :  { %v607_v63 = vpop.f32.mrf.mxu1 }
 0x167   :  { %v734_v34 = vmul.f32 %v702_v51, %v607_v63 }
 0x169   :  { %v749_v56 = vadd.f32 %v748_v36, %v734_v34 }
 0x16b   :  { %v640_v40 = vpop.f32.mrf.mxu3 }
 0x16c   :  { %v745_v12 = vmul.f32 %v713_v5, %v640_v40 }
 0x16e   :  { %v610_v20 = vpop.f32.mrf.mxu1 }
 0x16f   :  { %v735_v37 = vmul.f32 %v703_v58, %v610_v20 }
 0x171   :  { %v750_v42 = vadd.f32 %v749_v56, %v735_v37 }
 0x173   :  { %v643_v59 = vpop.f32.mrf.mxu3 }
 0x174   :  { %v746_v6 = vmul.f32 %v714_v55, %v643_v59 }
 0x176   :  { %v613_v21 = vpop.f32.mrf.mxu1 }
 0x177   :  { %v736_v22 = vmul.f32 %v704_v35, %v613_v21 }
 0x179   :  { %v751_v44 = vadd.f32 %v750_v42, %v736_v22 }
 0x17b   :  { %v646_v15 = vpop.f32.mrf.mxu3 }
 0x17c   :  { %v747_v17 = vmul.f32 %v715_v16, %v646_v15 }
 0x17e   :  { %v616_v24 = vpop.f32.mrf.mxu1 }
 0x17f   :  { %v737_v43 = vmul.f32 %v705_v39, %v616_v24 }
 0x181   :  { %v752_v47 = vadd.f32 %v751_v44, %v737_v43 }
 0x186   :  { %v619_v25 = vpop.f32.mrf.mxu1 }
 0x187   :  { %v738_v45 = vmul.f32 %v706_v8, %v619_v25 }
 0x189   :  { %v753_v31 = vadd.f32 %v752_v47, %v738_v45 }
 0x18e   :  { %v622_v26 = vpop.f32.mrf.mxu1 }
 0x18f   :  { %v739_v48 = vmul.f32 %v707_v23, %v622_v26 }
 0x191   :  { %v754_v54 = vadd.f32 %v753_v31, %v739_v48 }
 0x196   :  { %v625_v28 = vpop.f32.mrf.mxu1 }
 0x197   :  { %v740_v50 = vmul.f32 %v708_v46, %v625_v28 }
 0x199   :  { %v755_v62 = vadd.f32 %v754_v54, %v740_v50 }
 0x19e   :  { %v628_v30 = vpop.f32.mrf.mxu1 }
 0x19f   :  { %v741_v57 = vmul.f32 %v709_v49, %v628_v30 }
 0x1a1   :  { %v756_v1 = vadd.f32 %v755_v62, %v741_v57 }
 0x1a6   :  { %v631_v41 = vpop.f32.mrf.mxu1 }
 0x1a7   :  { %v742_v0 = vmul.f32 %v710_v52, %v631_v41 }
 0x1a9   :  { %v757_v4 = vadd.f32 %v756_v1, %v742_v0 }
 0x1ae   :  { %v634_v53 = vpop.f32.mrf.mxu1 }
 0x1af   :  { %v743_v3 = vmul.f32 %v711_v61, %v634_v53 }
 0x1b1   :  { %v758_v9 = vadd.f32 %v757_v4, %v743_v3 }
 0x1b6   :  { %v637_v7 = vpop.f32.mrf.mxu1 }
 0x1b7   :  { %v744_v11 = vmul.f32 %v712_v10, %v637_v7 }
 0x1b9   :  { %v759_v13 = vadd.f32 %v758_v9, %v744_v11 }
 0x1bb   :  { %v760_v38 = vadd.f32 %v759_v13, %v745_v12 }
 0x1bd   :  { %v761_v2 = vadd.f32 %v760_v38, %v746_v6 }
 0x1bf   :  { %v762_v18 = vadd.f32 %v761_v2, %v747_v17 }
 0x1c1   :  { %763 = vadd.xlane.f32.xlu1 %v762_v18 }
 0x234   :  { %v764_v19 = vpop.xlane.xlu1 %763 }
 0x235   :  { %v765_v63 = vrot.slane %v764_v19, 4 }
 0x237   :  { %v766_v20 = vadd.f32 %v765_v63, %v764_v19 }
 0x239   :  { %v767_v21 = vrot.slane %v766_v20, 2 }
 0x23b   :  { %v768_v24 = vadd.f32 %v767_v21, %v766_v20 }
 0x23d   :  { %v769_v25 = vrot.slane %v768_v24, 1 }
 0x23f   :  { %v770_v26 = vadd.f32 %v769_v25, %v768_v24 }
 0x241   :  { %887 = vpush %v770_v26 }
 0x272   :  { %s888_s15 = spop %887 }
 0x273   :  { %v772_v27 = vstv %s888_s15 }
 0x274   :  { %774 = vst [vmem:[#allocation4] sm:$0xff] %v772_v27 }
 0x275   :  { %785 = dma.vmem_to_hbm [thread:$0]  %s781_s5, 128, %s783_s13, [#allocation5]  }
 0x276   :  { %951 = dma.done.wait [#allocation5], 128  }
 0x277   :  { %952 = vsyncadd [#allocation5], 4294967168 }
 0x278   :  { %790 = vsyncpa [#allocation5], 1 }

</bundles_post_ra>
